<compile_context>
chip_gen: v5e
topology: v5e:2x2
jax: 0.10.0
libtpu: 0.0.40
codegen_flags: <defaults>
</compile_context>

<pallas_src>
import functools
import math

import jax
import jax.numpy as jnp
from jax.experimental import pallas as pl
from jax.experimental.pallas import tpu as pltpu


def _ohem_ce_kernel(logits_ref, labels_ref,
                    loss_ref, hsum_ref, hcnt_ref, vcnt_ref,
                    hsum_acc, hcnt_acc, vcnt_acc,
                    *, thresh, ignore_lb):
    i = pl.program_id(1)          # HW-tile index (innermost, "arbitrary")

    # Per-batch-element accumulator init on the first HW tile.
    @pl.when(i == 0)
    def _():
        hsum_acc[...] = jnp.zeros_like(hsum_acc)
        hcnt_acc[...] = jnp.zeros_like(hcnt_acc)
        vcnt_acc[...] = jnp.zeros_like(vcnt_acc)

    logits = logits_ref[0].astype(jnp.float32)   # (C, T): classes on sublanes
    labels = labels_ref[0]                       # (1, T) int32

    # Numerically stable log-sum-exp over the class (sublane) axis.
    m = jnp.max(logits, axis=0, keepdims=True)                       # (1, T)
    lse = jnp.log(jnp.sum(jnp.exp(logits - m), axis=0, keepdims=True)) + m

    # Gather logits[label] via select on an in-kernel iota (no one-hot mul).
    class_ids = jax.lax.broadcasted_iota(jnp.int32, logits.shape, 0)  # (C, T)
    picked = jnp.sum(jnp.where(class_ids == labels, logits, 0.0),
                     axis=0, keepdims=True)                           # (1, T)

    valid = labels != ignore_lb                                       # (1, T)
    # CrossEntropyLoss(reduction='none', ignore_index=...) => 0 at ignored px.
    loss = jnp.where(valid, lse - picked, 0.0)                        # (1, T)
    loss_ref[0] = loss.astype(loss_ref.dtype)                         # lane-dense store

    # Per-lane vector partials (VALU adds only; XLU stays free for the lse).
    hard = loss > thresh
    hsum_acc[...] += jnp.where(hard, loss, 0.0)
    hcnt_acc[...] += hard.astype(jnp.int32)
    vcnt_acc[...] += valid.astype(jnp.int32)

    # Flush per-batch-element partials once, at the last HW tile.
    @pl.when(i == pl.num_programs(1) - 1)
    def _():
        hsum_ref[0] = hsum_acc[...]
        hcnt_ref[0] = hcnt_acc[...]
        vcnt_ref[0] = vcnt_acc[...]


def ohem_ce_loss(logits, labels, *, thresh=0.7, ignore_lb=255, tile_hw=2048):
    """OhemCELoss.forward.  logits: (N, C, H, W), labels: (N, H, W) int."""
    n, c, h, w = logits.shape
    hw = h * w

    # Tile must be a multiple of 128 lanes; clamp to the (128-padded) extent.
    tile_hw = max(128, (tile_hw // 128) * 128)
    tile_hw = min(tile_hw, ((hw + 127) // 128) * 128)
    hw_pad = ((hw + tile_hw - 1) // tile_hw) * tile_hw

    # Free reshapes: keep native dtype, no transpose, no f32 copy in HBM.
    x = logits.reshape(n, c, hw)
    y = labels.reshape(n, 1, hw).astype(jnp.int32)
    if hw_pad != hw:
        # Padded pixels are labelled ignore_lb so they contribute nothing.
        x = jnp.pad(x, ((0, 0), (0, 0), (0, hw_pad - hw)))
        y = jnp.pad(y, ((0, 0), (0, 0), (0, hw_pad - hw)),
                    constant_values=ignore_lb)

    neg_log_thresh = float(-math.log(thresh))
    kernel = functools.partial(_ohem_ce_kernel,
                               thresh=neg_log_thresh, ignore_lb=ignore_lb)

    num_tiles = hw_pad // tile_hw
    grid = (n, num_tiles)

    loss_map, hsum_p, hcnt_p, vcnt_p = pl.pallas_call(
        kernel,
        out_shape=(
            jax.ShapeDtypeStruct((n, 1, hw_pad), jnp.float32),   # per-pixel loss
            jax.ShapeDtypeStruct((n, 1, tile_hw), jnp.float32),  # hard-loss lane partials
            jax.ShapeDtypeStruct((n, 1, tile_hw), jnp.int32),    # hard-count lane partials
            jax.ShapeDtypeStruct((n, 1, tile_hw), jnp.int32),    # valid-count lane partials
        ),
        grid_spec=pltpu.PrefetchScalarGridSpec(
            num_scalar_prefetch=0,
            grid=grid,
            in_specs=[
                pl.BlockSpec((1, c, tile_hw), lambda b, i: (b, 0, i)),
                pl.BlockSpec((1, 1, tile_hw), lambda b, i: (b, 0, i)),
            ],
            out_specs=[
                pl.BlockSpec((1, 1, tile_hw), lambda b, i: (b, 0, i)),
                pl.BlockSpec((1, 1, tile_hw), lambda b, i: (b, 0, 0)),
                pl.BlockSpec((1, 1, tile_hw), lambda b, i: (b, 0, 0)),
                pl.BlockSpec((1, 1, tile_hw), lambda b, i: (b, 0, 0)),
            ],
            scratch_shapes=[
                pltpu.VMEM((1, tile_hw), jnp.float32),
                pltpu.VMEM((1, tile_hw), jnp.int32),
                pltpu.VMEM((1, tile_hw), jnp.int32),
            ],
        ),
        compiler_params=pltpu.CompilerParams(
            dimension_semantics=("parallel", "arbitrary")),
    )(x, y)

    hsum = jnp.sum(hsum_p)                       # sum of losses > thresh
    hcnt = jnp.sum(hcnt_p)                       # how many exceeded the thresh
    vcnt = jnp.sum(vcnt_p)                       # number of non-ignored pixels
    n_min = vcnt // 16

    # Top-k fallback (data-dependent k) only when too few hard pixels; guarded
    # by lax.cond so the common case never runs top_k.  Padded/ignored pixels
    # carry loss 0 and cannot displace any positive loss.
    loss_flat = loss_map.reshape(-1)
    k_max = max(int(n * hw_pad) // 16, 1)        # static upper bound on n_min

    return jax.lax.cond(
        hcnt < n_min,
        lambda lv: jnp.sum(jnp.where(jnp.arange(k_max) < n_min,
                                     jax.lax.top_k(lv, k_max)[0], 0.0)),
        lambda lv: hsum,
        loss_flat)


def _reference(logits, labels, *, thresh=0.7, ignore_lb=255):
    """Pure-JAX reference mirroring the PyTorch module, for a sanity check."""
    n, c, h, w = logits.shape
    x = jnp.transpose(logits, (0, 2, 3, 1)).reshape(-1, c).astype(jnp.float32)
    y = labels.reshape(-1)
    valid = y != ignore_lb
    logz = jax.scipy.special.logsumexp(x, axis=-1)
    picked = jnp.take_along_axis(x, jnp.where(valid, y, 0)[:, None], axis=-1)[:, 0]
    loss = jnp.where(valid, logz - picked, 0.0)
    neg_log_thresh = -math.log(thresh)
    n_min = jnp.sum(valid).astype(jnp.int32) // 16
    hard = loss > neg_log_thresh
    hsum = jnp.sum(jnp.where(hard, loss, 0.0))
    hcnt = jnp.sum(hard).astype(jnp.int32)
    sorted_desc = jnp.sort(loss)[::-1]
    topk_sum = jnp.sum(jnp.where(jnp.arange(loss.shape[0]) < n_min, sorted_desc, 0.0))
    return jnp.where(hcnt < n_min, topk_sum, hsum)


if __name__ == "__main__":
    key = jax.random.PRNGKey(0)
    k1, k2, k3 = jax.random.split(key, 3)

    N, C, H, W = 2, 4, 16, 16
    logits = jax.random.normal(k1, (N, C, H, W), dtype=jnp.float32) * 2.0
    labels = jax.random.randint(k2, (N, H, W), 0, C, dtype=jnp.int32)
    # Sprinkle some ignore_index pixels.
    ignore_mask = jax.random.uniform(k3, (N, H, W)) < 0.1
    labels = jnp.where(ignore_mask, 255, labels)

    out = ohem_ce_loss(logits, labels, thresh=0.7, ignore_lb=255)
    out = jax.block_until_ready(out)

    ref = _reference(logits, labels, thresh=0.7, ignore_lb=255)
    assert jnp.allclose(out, ref, rtol=1e-4, atol=1e-4), (out, ref)

    print("KERNEL_OK")
</pallas_src>

<mosaic_0001>
module attributes {stable_mosaic.version = 11 : i64} {
  func.func @_ohem_ce_kernel(%arg0: i32, %arg1: i32, %arg2: memref<1x4x256xf32, #tpu.memory_space<vmem>>, %arg3: memref<1x1x256xi32, #tpu.memory_space<vmem>>, %arg4: memref<1x1x256xf32, #tpu.memory_space<vmem>>, %arg5: memref<1x1x256xf32, #tpu.memory_space<vmem>>, %arg6: memref<1x1x256xi32, #tpu.memory_space<vmem>>, %arg7: memref<1x1x256xi32, #tpu.memory_space<vmem>>, %arg8: memref<1x256xf32, #tpu.memory_space<vmem>>, %arg9: memref<1x256xi32, #tpu.memory_space<vmem>>, %arg10: memref<1x256xi32, #tpu.memory_space<vmem>>) attributes {dimension_semantics = [#tpu.dimension_semantics<parallel>, #tpu.dimension_semantics<arbitrary>], iteration_bounds = array<i64: 2, 1>, scalar_prefetch = 0 : i64, scratch_operands = 3 : i64, tpu.core_type = #tpu.core_type<tc>, window_params = [{transform_indices = @transform_0, window_bounds = array<i64: 1, 4, 256>}, {transform_indices = @transform_1, window_bounds = array<i64: 1, 1, 256>}, {transform_indices = @transform_2, window_bounds = array<i64: 1, 1, 256>}, {transform_indices = @transform_3, window_bounds = array<i64: 1, 1, 256>}, {transform_indices = @transform_4, window_bounds = array<i64: 1, 1, 256>}, {transform_indices = @transform_5, window_bounds = array<i64: 1, 1, 256>}]} {
    %c0_i32 = arith.constant 0 : i32
    %0 = arith.cmpi eq, %arg1, %c0_i32 : i32
    %1 = arith.extui %0 : i1 to i32
    %c0_i32_0 = arith.constant 0 : i32
    %2 = arith.cmpi ne, %1, %c0_i32_0 : i32
    scf.if %2 {
      %cst_29 = arith.constant 0.000000e+00 : f32
      %49 = vector.broadcast %cst_29 : f32 to vector<1x256xf32>
      %c0_30 = arith.constant 0 : index
      %c0_31 = arith.constant 0 : index
      %50 = vector.load %arg8[%c0_30, %c0_31] : memref<1x256xf32, #tpu.memory_space<vmem>>, vector<1x256xf32>
      tpu.vector_store %arg8[%c0_30, %c0_31], %49 {strides = array<i32>} : memref<1x256xf32, #tpu.memory_space<vmem>>, vector<1x256xf32>,
      %c0_i32_32 = arith.constant 0 : i32
      %51 = vector.broadcast %c0_i32_32 : i32 to vector<1x256xi32>
      %c0_33 = arith.constant 0 : index
      %c0_34 = arith.constant 0 : index
      %52 = vector.load %arg9[%c0_33, %c0_34] : memref<1x256xi32, #tpu.memory_space<vmem>>, vector<1x256xi32>
      tpu.vector_store %arg9[%c0_33, %c0_34], %51 {strides = array<i32>} : memref<1x256xi32, #tpu.memory_space<vmem>>, vector<1x256xi32>,
      %c0_i32_35 = arith.constant 0 : i32
      %53 = vector.broadcast %c0_i32_35 : i32 to vector<1x256xi32>
      %c0_36 = arith.constant 0 : index
      %c0_37 = arith.constant 0 : index
      %54 = vector.load %arg10[%c0_36, %c0_37] : memref<1x256xi32, #tpu.memory_space<vmem>>, vector<1x256xi32>
      tpu.vector_store %arg10[%c0_36, %c0_37], %53 {strides = array<i32>} : memref<1x256xi32, #tpu.memory_space<vmem>>, vector<1x256xi32>,
    } else {
    }
    %c0 = arith.constant 0 : index
    %c0_1 = arith.constant 0 : index
    %c0_2 = arith.constant 0 : index
    %3 = vector.load %arg2[%c0, %c0_1, %c0_2] : memref<1x4x256xf32, #tpu.memory_space<vmem>>, vector<1x4x256xf32>
    %4 = vector.shape_cast %3 : vector<1x4x256xf32> to vector<4x256xf32>
    %c0_3 = arith.constant 0 : index
    %c0_4 = arith.constant 0 : index
    %c0_5 = arith.constant 0 : index
    %5 = vector.load %arg3[%c0_3, %c0_4, %c0_5] : memref<1x1x256xi32, #tpu.memory_space<vmem>>, vector<1x1x256xi32>
    %6 = vector.shape_cast %5 : vector<1x1x256xi32> to vector<1x256xi32>
    %cst = arith.constant dense<0xFF800000> : vector<256xf32>
    %7 = vector.multi_reduction <maximumf>, %4, %cst [0] : vector<4x256xf32> to vector<256xf32>
    %8 = vector.shape_cast %7 : vector<256xf32> to vector<1x256xf32>
    %9 = vector.broadcast %8 : vector<1x256xf32> to vector<4x256xf32>
    %10 = arith.subf %4, %9 : vector<4x256xf32>
    %11 = math.exp %10 : vector<4x256xf32>
    %cst_6 = arith.constant dense<0.000000e+00> : vector<256xf32>
    %12 = vector.multi_reduction <add>, %11, %cst_6 [0] : vector<4x256xf32> to vector<256xf32>
    %13 = vector.shape_cast %12 : vector<256xf32> to vector<1x256xf32>
    %14 = math.log %13 : vector<1x256xf32>
    %15 = arith.addf %14, %8 : vector<1x256xf32>
    %16 = tpu.iota {dimensions = array<i32: 0>} : vector<4x256xi32>
    %17 = vector.broadcast %6 : vector<1x256xi32> to vector<4x256xi32>
    %18 = arith.cmpi eq, %16, %17 : vector<4x256xi32>
    %cst_7 = arith.constant 0.000000e+00 : f32
    %19 = vector.broadcast %cst_7 : f32 to vector<4x256xf32>
    %20 = arith.select %18, %4, %19 : vector<4x256xi1>, vector<4x256xf32>
    %cst_8 = arith.constant dense<0.000000e+00> : vector<256xf32>
    %21 = vector.multi_reduction <add>, %20, %cst_8 [0] : vector<4x256xf32> to vector<256xf32>
    %22 = vector.shape_cast %21 : vector<256xf32> to vector<1x256xf32>
    %c255_i32 = arith.constant 255 : i32
    %23 = vector.broadcast %c255_i32 : i32 to vector<1x256xi32>
    %24 = arith.cmpi ne, %6, %23 : vector<1x256xi32>
    %25 = arith.subf %15, %22 : vector<1x256xf32>
    %cst_9 = arith.constant 0.000000e+00 : f32
    %26 = vector.broadcast %cst_9 : f32 to vector<1x256xf32>
    %27 = arith.select %24, %25, %26 : vector<1x256xi1>, vector<1x256xf32>
    %c0_10 = arith.constant 0 : index
    %c0_11 = arith.constant 0 : index
    %c0_12 = arith.constant 0 : index
    %28 = vector.load %arg4[%c0_10, %c0_11, %c0_12] : memref<1x1x256xf32, #tpu.memory_space<vmem>>, vector<1x1x256xf32>
    %29 = vector.shape_cast %28 : vector<1x1x256xf32> to vector<1x256xf32>
    %30 = vector.shape_cast %27 : vector<1x256xf32> to vector<1x1x256xf32>
    tpu.vector_store %arg4[%c0_10, %c0_11, %c0_12], %30 {strides = array<i32>} : memref<1x1x256xf32, #tpu.memory_space<vmem>>, vector<1x1x256xf32>,
    %cst_13 = arith.constant 0.356674939 : f32
    %31 = vector.broadcast %cst_13 : f32 to vector<1x256xf32>
    %32 = arith.cmpf ogt, %27, %31 : vector<1x256xf32>
    %c0_14 = arith.constant 0 : index
    %c0_15 = arith.constant 0 : index
    %33 = vector.load %arg8[%c0_14, %c0_15] : memref<1x256xf32, #tpu.memory_space<vmem>>, vector<1x256xf32>
    %cst_16 = arith.constant 0.000000e+00 : f32
    %34 = vector.broadcast %cst_16 : f32 to vector<1x256xf32>
    %35 = arith.select %32, %27, %34 : vector<1x256xi1>, vector<1x256xf32>
    %36 = arith.addf %33, %35 : vector<1x256xf32>
    %c0_17 = arith.constant 0 : index
    %c0_18 = arith.constant 0 : index
    %37 = vector.load %arg8[%c0_17, %c0_18] : memref<1x256xf32, #tpu.memory_space<vmem>>, vector<1x256xf32>
    tpu.vector_store %arg8[%c0_17, %c0_18], %36 {strides = array<i32>} : memref<1x256xf32, #tpu.memory_space<vmem>>, vector<1x256xf32>,
    %c0_19 = arith.constant 0 : index
    %c0_20 = arith.constant 0 : index
    %38 = vector.load %arg9[%c0_19, %c0_20] : memref<1x256xi32, #tpu.memory_space<vmem>>, vector<1x256xi32>
    %39 = arith.extui %32 : vector<1x256xi1> to vector<1x256xi32>
    %40 = arith.addi %38, %39 : vector<1x256xi32>
    %c0_21 = arith.constant 0 : index
    %c0_22 = arith.constant 0 : index
    %41 = vector.load %arg9[%c0_21, %c0_22] : memref<1x256xi32, #tpu.memory_space<vmem>>, vector<1x256xi32>
    tpu.vector_store %arg9[%c0_21, %c0_22], %40 {strides = array<i32>} : memref<1x256xi32, #tpu.memory_space<vmem>>, vector<1x256xi32>,
    %c0_23 = arith.constant 0 : index
    %c0_24 = arith.constant 0 : index
    %42 = vector.load %arg10[%c0_23, %c0_24] : memref<1x256xi32, #tpu.memory_space<vmem>>, vector<1x256xi32>
    %43 = arith.extui %24 : vector<1x256xi1> to vector<1x256xi32>
    %44 = arith.addi %42, %43 : vector<1x256xi32>
    %c0_25 = arith.constant 0 : index
    %c0_26 = arith.constant 0 : index
    %45 = vector.load %arg10[%c0_25, %c0_26] : memref<1x256xi32, #tpu.memory_space<vmem>>, vector<1x256xi32>
    tpu.vector_store %arg10[%c0_25, %c0_26], %44 {strides = array<i32>} : memref<1x256xi32, #tpu.memory_space<vmem>>, vector<1x256xi32>,
    %c0_i32_27 = arith.constant 0 : i32
    %46 = arith.cmpi eq, %arg1, %c0_i32_27 : i32
    %47 = arith.extui %46 : i1 to i32
    %c0_i32_28 = arith.constant 0 : i32
    %48 = arith.cmpi ne, %47, %c0_i32_28 : i32
    scf.if %48 {
      %c0_29 = arith.constant 0 : index
      %c0_30 = arith.constant 0 : index
      %49 = vector.load %arg8[%c0_29, %c0_30] : memref<1x256xf32, #tpu.memory_space<vmem>>, vector<1x256xf32>
      %c0_31 = arith.constant 0 : index
      %c0_32 = arith.constant 0 : index
      %c0_33 = arith.constant 0 : index
      %50 = vector.load %arg5[%c0_31, %c0_32, %c0_33] : memref<1x1x256xf32, #tpu.memory_space<vmem>>, vector<1x1x256xf32>
      %51 = vector.shape_cast %50 : vector<1x1x256xf32> to vector<1x256xf32>
      %52 = vector.shape_cast %49 : vector<1x256xf32> to vector<1x1x256xf32>
      tpu.vector_store %arg5[%c0_31, %c0_32, %c0_33], %52 {strides = array<i32>} : memref<1x1x256xf32, #tpu.memory_space<vmem>>, vector<1x1x256xf32>,
      %c0_34 = arith.constant 0 : index
      %c0_35 = arith.constant 0 : index
      %53 = vector.load %arg9[%c0_34, %c0_35] : memref<1x256xi32, #tpu.memory_space<vmem>>, vector<1x256xi32>
      %c0_36 = arith.constant 0 : index
      %c0_37 = arith.constant 0 : index
      %c0_38 = arith.constant 0 : index
      %54 = vector.load %arg6[%c0_36, %c0_37, %c0_38] : memref<1x1x256xi32, #tpu.memory_space<vmem>>, vector<1x1x256xi32>
      %55 = vector.shape_cast %54 : vector<1x1x256xi32> to vector<1x256xi32>
      %56 = vector.shape_cast %53 : vector<1x256xi32> to vector<1x1x256xi32>
      tpu.vector_store %arg6[%c0_36, %c0_37, %c0_38], %56 {strides = array<i32>} : memref<1x1x256xi32, #tpu.memory_space<vmem>>, vector<1x1x256xi32>,
      %c0_39 = arith.constant 0 : index
      %c0_40 = arith.constant 0 : index
      %57 = vector.load %arg10[%c0_39, %c0_40] : memref<1x256xi32, #tpu.memory_space<vmem>>, vector<1x256xi32>
      %c0_41 = arith.constant 0 : index
      %c0_42 = arith.constant 0 : index
      %c0_43 = arith.constant 0 : index
      %58 = vector.load %arg7[%c0_41, %c0_42, %c0_43] : memref<1x1x256xi32, #tpu.memory_space<vmem>>, vector<1x1x256xi32>
      %59 = vector.shape_cast %58 : vector<1x1x256xi32> to vector<1x256xi32>
      %60 = vector.shape_cast %57 : vector<1x256xi32> to vector<1x1x256xi32>
      tpu.vector_store %arg7[%c0_41, %c0_42, %c0_43], %60 {strides = array<i32>} : memref<1x1x256xi32, #tpu.memory_space<vmem>>, vector<1x1x256xi32>,
    } else {
    }
    return
  }
  func.func @transform_0(%arg0: i32, %arg1: i32) -> (i32, i32, i32) {
    %c0_i32 = arith.constant 0 : i32
    %c0_i32_0 = arith.constant 0 : i32
    return %arg0, %c0_i32, %arg1 : i32, i32, i32
  }
  func.func @transform_1(%arg0: i32, %arg1: i32) -> (i32, i32, i32) {
    %c0_i32 = arith.constant 0 : i32
    %c0_i32_0 = arith.constant 0 : i32
    return %arg0, %c0_i32, %arg1 : i32, i32, i32
  }
  func.func @transform_2(%arg0: i32, %arg1: i32) -> (i32, i32, i32) {
    %c0_i32 = arith.constant 0 : i32
    %c0_i32_0 = arith.constant 0 : i32
    return %arg0, %c0_i32, %arg1 : i32, i32, i32
  }
  func.func @transform_3(%arg0: i32, %arg1: i32) -> (i32, i32, i32) {
    %c0_i32 = arith.constant 0 : i32
    %c0_i32_0 = arith.constant 0 : i32
    %c0_i32_1 = arith.constant 0 : i32
    return %arg0, %c0_i32, %c0_i32_0 : i32, i32, i32
  }
  func.func @transform_4(%arg0: i32, %arg1: i32) -> (i32, i32, i32) {
    %c0_i32 = arith.constant 0 : i32
    %c0_i32_0 = arith.constant 0 : i32
    %c0_i32_1 = arith.constant 0 : i32
    return %arg0, %c0_i32, %c0_i32_0 : i32, i32, i32
  }
  func.func @transform_5(%arg0: i32, %arg1: i32) -> (i32, i32, i32) {
    %c0_i32 = arith.constant 0 : i32
    %c0_i32_0 = arith.constant 0 : i32
    %c0_i32_1 = arith.constant 0 : i32
    return %arg0, %c0_i32, %c0_i32_0 : i32, i32, i32
  }
}

</mosaic_0001>

<bundles_post_ra>
// kernel: tpu_custom_call.1
= control target key start
LH: loop header
LB: loop body
LE: loop exit
PB: predicated region body
PF: predicated region fallthrough
CT: control target
= control target key end

     0   :  { %s1425_s0 = inlined_call_operand.hbm [shape: f32[2,4,256], index: 0, kind: input, shape index: {}]   ;;  %s1426_s1 = inlined_call_operand.hbm [shape: s32[2,1,256], index: 1, kind: input, shape index: {}]   ;;  %s1427_s2 = inlined_call_operand.hbm [shape: f32[2,1,256], index: 2, kind: output, shape index: {0}]   ;;  %s1428_s3 = inlined_call_operand.hbm [shape: f32[2,1,256], index: 3, kind: output, shape index: {1}]   ;;  %s1429_s4 = inlined_call_operand.hbm [shape: s32[2,1,256], index: 4, kind: output, shape index: {2}]   ;;  %s1430_s5 = inlined_call_operand.hbm [shape: s32[2,1,256], index: 5, kind: output, shape index: {3}]  }
   0x1   :  { %1433 = sst [smem:[#allocation22_spill]] %s1425_s0 }
   0x2   :  { %11 = vsyncpa [#allocation6], 0 }
   0x3   :  { %13 = vsyncpa [#allocation6 + $0x1], 0 }
   0x4   :  { %14 = vsyncpa [#allocation9], 0 }
   0x5   :  { %16 = vsyncpa [#allocation9 + $0x1], 0 }
   0x6   :  { %17 = vsyncpa [#allocation7], 0 }
   0x7   :  { %19 = vsyncpa [#allocation7 + $0x1], 0 }
   0x8   :  { %20 = vsyncpa [#allocation12], 0 }
   0x9   :  { %22 = vsyncpa [#allocation12 + $0x1], 0 }
   0xa   :  { %23 = vsyncpa [#allocation15], 0 }
   0xb   :  { %25 = vsyncpa [#allocation15 + $0x1], 0  ;;  %s1135_s18 = smov 0   ;;  %s1137_s19 = smov 0  }
   0xc   :  { %s1139_s20 = smov 0   ;;  %s1141_s21 = smov 0  }
   0xd   :  { %s1143_s22 = smov 0   ;;  %s1145_s23 = smov 0  }
   0xe LB: > { %s1166_s24 = sadd.s32 4294967295, %s1101_s23   ;;  %s1431_s25 = sadd.s32 4294967294, %s1101_s23   ;;  %s1101_s23 = sphi %s1145_s23, %s31_s23   ;;  %s1097_s22 = sphi %s1143_s22, %s1453_s22   ;;  %s1093_s21 = sphi %s1141_s21, %s1452_s21   ;;  %s1089_s20 = sphi %s1139_s20, %s1451_s20   ;;  %s1085_s19 = sphi %s1137_s19, %s1450_s19   ;;  %s1081_s18 = sphi %s1135_s18, %s1449_s18  }
   0xf   : > { %s43_s26 = sadd.s32 1, %s1097_s22  ;;  %s52_s27 = sadd.s32 1, %s1089_s20 }
  0x10   : > { %p45_p0 = scmp.ge.s32.totalorder %s43_s26, 2  ;;  %p59_p1 = scmp.ne.s32.totalorder %s1089_s20, %s1085_s19 }
  0x11   : > { %p60_p2 = scmp.eq.s32.totalorder %s1101_s23, 0  ;;  %p65_p3 = scmp.ne.s32.totalorder %s1085_s19, %s1081_s18 }
  0x12   : > { %s1455_s26 = smov (%p45_p0, %s43_s26), 0  ;;  %p66_p5 = scmp.eq.s32.totalorder %s1166_s24, 0 }
  0x13   : > { %1434 = sst [smem:[#allocation21_spill]] %s1455_s26  ;;  %p1178_p4 = por %p60_p2, %p59_p1 }
  0x14   : > { %s47_s29 = ssub.s32 %s1097_s22, %s1455_s26  ;;  %p119_p6 = scmp.eq.s32.totalorder %s1166_s24, 1 }
  0x15   : > { %p50_p7 = scmp.eq.s32.totalorder %s47_s29, 0  ;;  %p1186_p8 = por %p66_p5, %p65_p3 }
  0x16   : > { %p1190_p9 = por %p119_p6, %p59_p1  ;;  %p125_p10 = scmp.eq.s32.totalorder %s1431_s25, 1 }
  0x17   : > { %s1197_s7 = scalar_select %p50_p7, %s1089_s20, %s52_s27  }
  0x18   : > { %p1199_p11 = por %p125_p10, %p65_p3  ;;  %p749_p12 = scmp.ge.s32.totalorder %s1101_s23, 2 }
  0x19   : > { %p805_p13 = scmp.lt.s32.totalorder %s1101_s23, 2  ;;  %s223_s9 = sand.u32 1, %s1089_s20  }
  0x1a   : > { %s750_s10 = sshll.u32 %s223_s9, 3  ;;  %s772_s11 = sshll.u32 %s1097_s22, 3 }
  0x1b   : > { %s1439_s0 = sld [smem:[#allocation22_spill]]  ;;  %s227_s15 = scalar_lea.vmem [#allocation5], %s750_s10 }
  0x1c   : > { %s238_s16 = sshll.u32 %s227_s15, 4  ;;  %p1212_p0 = pnand %p805_p13, %p1178_p4  ;;  %s239_s16 = int_to_ptr.vmem [resolvable:$true] %s238_s16 }
  0x1d   : > { %p755_p1 = scmp.ge.s32.totalorder %s1101_s23, 1  ;;  %p264_p2 = scmp.lt.s32.totalorder %s1101_s23, 3 }
  0x1e   : > { %s224_s29 = scalar_lea.sflag [#allocation6], %s223_s9  ;;  %s753_s12 = sshll.u32 %s223_s9, 1 }
  0x1f   : > { %p265_p3 = pnand %p755_p1, %p264_p2  ;;  %s249_s15 = scalar_lea.vmem [#allocation8], %s753_s12 }
  0x20   : > { %s259_s28 = sshll.u32 %s249_s15, 4  ;;  %s1227_s26 = sand.u32 (!%p265_p3), 1, %s1085_s19   ;;  %s260_s28 = int_to_ptr.vmem [resolvable:$true] %s259_s28 }
  0x21   : > { %s234_s14 = scalar_lea.hbm %s1439_s0, %s772_s11  ;;  %s754_s11 = sshll.u32 %s1097_s22, 1 }
  0x22   : > { %s236_s17 = sshll.u32 %s234_s14, 4  ;;  %s255_s14 = scalar_lea.hbm %s1426_s1, %s754_s11  ;;  %s237_s17 = int_to_ptr.hbm [resolvable:$true] %s236_s17 }
  0x23   : > { %788 = dma.hbm_to_vmem [thread:$0]  (!%p1212_p0), %s237_s17, 128, %s239_s16, %s224_s29  }
  0x24   : > { %s257_s25 = sshll.u32 %s255_s14, 4  ;;  %s246_s0 = scalar_lea.sflag [#allocation9], %s223_s9  ;;  %s258_s25 = int_to_ptr.hbm [resolvable:$true] %s257_s25 }
  0x25   : > { %791 = dma.hbm_to_vmem [thread:$0]  (!%p1212_p0), %s258_s25, 32, %s260_s28, %s246_s0  }
  0x26   : > { %268 = sbr.rel (%p265_p3) target bundleno = 155 (0x9b), region = 28  ;;  %s756_s16 = sshll.u32 (!%p265_p3), %s1227_s26, 3 }
  0x27   : > { %s271_s17 = scalar_lea.sflag (!%p265_p3), [#allocation6], %s1227_s26  ;;  %s274_s29 = scalar_lea.vmem (!%p265_p3), [#allocation5], %s756_s16 }
  0x2b   : > { %1060 = dma.done.wait (%p1186_p8), %s271_s17, 128  }
  0x2c   : > { %1062 = vsyncadd (%p1186_p8), %s271_s17, 4294967168  ;;  %s1236_s9 = sshll.u32 %s1227_s26, 1  ;;  %s281_s0 = scalar_lea.sflag [#allocation9], %s1227_s26 }
  0x2d   : > { %s284_s25 = scalar_lea.vmem [#allocation8], %s1236_s9 }
  0x2e   : > { %1064 = dma.done.wait (%p1186_p8), %s281_s0, 32  }
  0x2f   : > { %1066 = vsyncadd (%p1186_p8), %s281_s0, 4294967264  ;;  %v346_v0 = vld [vmem:[%s274_s29] sm:$0xff]  ;;  %vm354_vm0 = vcmask 1043456   ;;  %v339_v13 = vlaneseq  ;;  %v1103_v18 = vmov 0.0   ;;  %v1104_v19 = vmov 0   ;;  %s1278_s30 = sshll.u32 %s1093_s21, 1 }
  0x30   : > { %349 = vst [vmem:[#allocation1] ss:$2 sm:$0xff] %v346_v0  ;;  %v1267_v26 = vld [vmem:[%s284_s25] sm:$0x3]  ;;  %s537_s12 = scalar_lea.hbm %s1430_s5, %s1278_s30  ;;  %s331_s11 = scalar_lea.vmem [#allocation14], %s1236_s9 }
  0x31   : > { %vm1246_vm1 = vcmp.lt.s32.totalorder %v339_v13, 256  ;;  %vm430_vm2 = vcmp.ne.s32.totalorder %v1267_v26, 255  ;;  %v404_v31 = vshrl.u32 %v339_v13, 7  ;;  %v405_v35 = vperm.slane %v1267_v26, 0  ;;  %s1295_s10 = sshll.u32 %s331_s11, 4  ;;  %s1301_s13 = sshll.u32 %s537_s12, 4  ;;  %s540_s10 = int_to_ptr.vmem [resolvable:$true] %s1295_s10  ;;  %s542_s13 = int_to_ptr.hbm [resolvable:$true] %s1301_s13 }
  0x32   : > { %343 = vst.msk [vmem:[#allocation2] sm:$0x3] %vm1246_vm1, %v1103_v18  ;;  %v455_v32 = vsel %vm430_vm2, 1, %v1104_v19  ;;  %v406_v36 = vperm.slane %v1267_v26, 1  ;;  %s483_s14 = scalar_lea.sflag [#allocation15], %s1227_s26  ;;  %s937_s15 = sshra.s32 %s542_s13, 4  ;;  %s938_s15 = int_to_ptr.hbm [resolvable:$true] %s937_s15 }
  0x33   : > { %344 = vst.msk [vmem:[#allocation3] sm:$0x3] %vm1246_vm1, %v1104_v19  ;;  %vm1280_vm3 = vcmp.eq.s32.totalorder %v404_v31, %v405_v35  ;;  %s939_s28 = scalar_lea.hbm %s938_s15, 2  ;;  %s943_s29 = scalar_lea.hbm %s1430_s5, 4 }
  0x34   : > { %345 = vst.msk [vmem:[#allocation4] sm:$0x3] %vm1246_vm1, %v1104_v19  ;;  %vm1284_vm4 = vcmp.eq.s32.totalorder %v404_v31, %v406_v36  ;;  %p940_p4 = scmp.ne.s32.totalorder %s938_s15, %s939_s28  ;;  %p944_p7 = scmp.lt.s32.totalorder %s938_s15, %s1430_s5 }
  0x35   : > { %p945_p8 = scmp.lt.s32.totalorder %s943_s29, %s939_s28 }
  0x36   : > { %p941_p5 = pnand %p940_p4, %p1190_p9 }
  0x37   : > { %v350_v1 = vld.sshfl [vmem:[#allocation1] sm:$0xff pattern:$0x75316420]  ;;  %v351_v2 = vld.sshfl [vmem:[#allocation1 + $0x8] sm:$0xff pattern:$0x75316420]  ;;  %p946_p10 = por %p945_p8, %p944_p7 }
  0x38   : > { %v355_v3 = vsel %vm354_vm0, %v350_v1, -inf  ;;  %v362_v4 = vsel %vm354_vm0, %v351_v2, -inf  ;;  %p942_p6 = pneg %p941_p5 }
  0x39   : > { %v356_v5 = vrot.slane %v355_v3, 4  ;;  %v363_v6 = vrot.slane %v362_v4, 4 }
  0x3a   : > { %p947_p13 = pnand %p946_p10, %p942_p6 }
  0x3b   : > { %v357_v7 = vmax.f32 %v355_v3, %v356_v5  ;;  %v364_v8 = vmax.f32 %v362_v4, %v363_v6  ;;  %v454_v37 = vld [vmem:[#allocation4] sm:$0x3] }
  0x3c   : > { %v456_v40 = vadd.s32 %v455_v32, %v454_v37 }
  0x3d   : > { %v358_v9 = vrot.slane %v357_v7, 2  ;;  %v365_v10 = vrot.slane %v364_v8, 2 }
  0x3e   : > { %457 = vst.msk [vmem:[#allocation4] sm:$0x3] %vm1246_vm1, %v456_v40 }
  0x3f   : > { %v359_v11 = vmax.f32 %v357_v7, %v358_v9  ;;  %v366_v12 = vmax.f32 %v364_v8, %v365_v10 }
  0x41   : > { %v360_v14 = vrot.slane %v359_v11, 1  ;;  %v367_v15 = vrot.slane %v366_v12, 1 }
  0x43   : > { %v1250_v17 = vmax.f32 %v366_v12, %v367_v15  ;;  %v1257_v20 = vmax.f32 %v359_v11, %v360_v14 }
  0x45   : > { %v371_v21 = vrot.slane %v1250_v17, 4  ;;  %v465_v61 = vld [vmem:[#allocation4] sm:$0x3] }
  0x46   : > { %466 = vst.msk [vmem:[%s331_s11] sm:$0x3] %vm1246_vm1, %v465_v61 }
  0x47   : > { %v372_v22 = vsel %vm354_vm0, %v1257_v20, %v371_v21 }
  0x48   : > { %v374_v23 = vsub.f32 %v346_v0, %v372_v22 }
  0x4a   : > { %v375_v24 = vmul.f32 1.442695, %v374_v23 }
  0x4c   : > { %857 = vpow2.f32 %v375_v24 }
  0x52   : > { %v858_v25 = vpop.eup %857 }
  0x53   : > { %378 = vst [vmem:[#allocation1] ss:$2 sm:$0xff] %v858_v25 }
  0x5a   : > { %v379_v27 = vld.sshfl [vmem:[#allocation1] sm:$0xff pattern:$0x75316420]  ;;  %v380_v28 = vld.sshfl [vmem:[#allocation1 + $0x8] sm:$0xff pattern:$0x75316420] }
  0x5b   : > { %v383_v29 = vsel %vm354_vm0, %v379_v27, 0.0  ;;  %v390_v30 = vsel %vm354_vm0, %v380_v28, 0.0  ;;  %409 = vst [vmem:[#allocation1] ss:$2 sm:$0xff] %v346_v0 }
  0x5c   : > { %v384_v33 = vrot.slane %v383_v29, 4  ;;  %v391_v34 = vrot.slane %v390_v30, 4 }
  0x5e   : > { %v385_v38 = vadd.f32 %v384_v33, %v383_v29  ;;  %v392_v39 = vadd.f32 %v391_v34, %v390_v30 }
  0x60   : > { %v386_v41 = vrot.slane %v385_v38, 2  ;;  %v393_v42 = vrot.slane %v392_v39, 2 }
  0x62   : > { %v387_v45 = vadd.f32 %v386_v41, %v385_v38  ;;  %v394_v46 = vadd.f32 %v393_v42, %v392_v39  ;;  %v410_v47 = vld.sshfl [vmem:[#allocation1] sm:$0xff pattern:$0x75316420]  ;;  %v411_v48 = vld.sshfl [vmem:[#allocation1 + $0x8] sm:$0xff pattern:$0x75316420] }
  0x63   : > { %v414_v49 = vsel %vm1280_vm3, %v410_v47, 0.0  ;;  %v415_v50 = vsel %vm1284_vm4, %v411_v48, 0.0 }
  0x64   : > { %v388_v51 = vrot.slane %v387_v45, 1  ;;  %v395_v52 = vrot.slane %v394_v46, 1  ;;  %v416_v53 = vsel %vm354_vm0, %v414_v49, 0.0  ;;  %v423_v54 = vsel %vm354_vm0, %v415_v50, 0.0 }
  0x65   : > { %v417_v55 = vrot.slane %v416_v53, 4  ;;  %v424_v56 = vrot.slane %v423_v54, 4 }
  0x66   : > { %v389_v57 = vadd.f32 %v388_v51, %v387_v45  ;;  %v396_v58 = vadd.f32 %v395_v52, %v394_v46 }
  0x67   : > { %v418_v59 = vadd.f32 %v417_v55, %v416_v53  ;;  %v425_v60 = vadd.f32 %v424_v56, %v423_v54 }
  0x68   : > { %859 = vlog2.f32 %v389_v57 }
  0x69   : > { %861 = vlog2.f32 %v396_v58  ;;  %v419_v62 = vrot.slane %v418_v59, 2  ;;  %v426_v63 = vrot.slane %v425_v60, 2 }
  0x6a   : > { %950 = shalt.err (!%p947_p13)
}
  0x6b   : > { %780 = dma.vmem_to_hbm [thread:$0]  (%p1190_p9), %s540_s10, 32, %s542_s13, %s483_s14   ;;  %v427_v0 = vadd.f32 %v426_v63, %v425_v60  ;;  %v420_v1 = vadd.f32 %v419_v62, %v418_v59  ;;  %vm436_vm5 = vcmask 1040384   ;;  %v446_v18 = vld [vmem:[#allocation2] sm:$0x3] }
  0x6c   : > { %s495_s12 = scalar_lea.hbm %s1427_s2, %s1278_s30  ;;  %s310_s11 = scalar_lea.vmem [#allocation10], %s1236_s9 }
  0x6d   : > { %v428_v3 = vrot.slane %v427_v0, 1  ;;  %v421_v7 = vrot.slane %v420_v1, 1  ;;  %s1327_s10 = sshll.u32 %s310_s11, 4  ;;  %s499_s13 = sshll.u32 %s495_s12, 4  ;;  %s498_s10 = int_to_ptr.vmem [resolvable:$true] %s1327_s10  ;;  %s500_s13 = int_to_ptr.hbm [resolvable:$true] %s499_s13 }
  0x6e   : > { %v860_v2 = vpop.eup %859  ;;  %s468_s14 = scalar_lea.sflag [#allocation7], %s1227_s26  ;;  %s965_s15 = sshra.s32 %s500_s13, 4  ;;  %s966_s15 = int_to_ptr.hbm [resolvable:$true] %s965_s15 }
  0x6f   : > { %v862_v4 = vpop.eup %861  ;;  %v398_v5 = vmul.f32 0.6931472, %v860_v2  ;;  %v429_v10 = vadd.f32 %v428_v3, %v427_v0  ;;  %v422_v11 = vadd.f32 %v421_v7, %v420_v1  ;;  %s967_s28 = scalar_lea.hbm %s966_s15, 2  ;;  %s971_s29 = scalar_lea.hbm %s1427_s2, 4 }
  0x70   : > { %v400_v6 = vmul.f32 0.6931472, %v862_v4  ;;  %p968_p0 = scmp.ne.s32.totalorder %s966_s15, %s967_s28  ;;  %p972_p3 = scmp.lt.s32.totalorder %s966_s15, %s1427_s2 }
  0x71   : > { %v401_v8 = vadd.f32 %v398_v5, %v1257_v20  ;;  %v450_v20 = vld [vmem:[#allocation3] sm:$0x3]  ;;  %p973_p4 = scmp.lt.s32.totalorder %s971_s29, %s967_s28 }
  0x72   : > { %v402_v9 = vadd.f32 %v400_v6, %v1250_v17  ;;  %p969_p1 = pnand %p968_p0, %p1190_p9 }
  0x73   : > { %v431_v13 = vsub.f32 %v401_v8, %v422_v11  ;;  %p974_p5 = por %p973_p4, %p972_p3 }
  0x74   : > { %v432_v12 = vsub.f32 %v402_v9, %v429_v10  ;;  %p970_p2 = pneg %p969_p1 }
  0x76   : > { %v435_v14 = vrot.slane %v432_v12, 7  ;;  %p975_p6 = pnand %p974_p5, %p970_p2 }
  0x78   : > { %v437_v15 = vsel %vm436_vm5, %v431_v13, %v435_v14 }
  0x79   : > { %v439_v17 = vsel %vm430_vm2, %v437_v15, 0.0 }
  0x7a   : > { %444 = vst.msk [vmem:[%s310_s11] sm:$0x3] %vm1246_vm1, %v439_v17  ;;  %vm445_vm6 = vcmp.gt.f32.partialorder %v439_v17, 0.35667494 }
  0x7b   : > { %v447_v21 = vsel %vm445_vm6, %v439_v17, 0.0  ;;  %v451_v22 = vsel %vm445_vm6, 1, %v1104_v19 }
  0x7c   : > { %978 = shalt.err (!%p975_p6)
}
  0x7d   : > { %777 = dma.vmem_to_hbm [thread:$0]  (%p1190_p9), %s498_s10, 32, %s500_s13, %s468_s14   ;;  %v448_v19 = vadd.f32 %v447_v21, %v446_v18  ;;  %v452_v23 = vadd.s32 %v451_v22, %v450_v20 }
  0x7e   : > { %s509_s21 = scalar_lea.hbm %s1428_s3, %s1278_s30  ;;  %s523_s15 = scalar_lea.hbm %s1429_s4, %s1278_s30 }
  0x7f   : > { %449 = vst.msk [vmem:[#allocation2] sm:$0x3] %vm1246_vm1, %v448_v19  ;;  %s317_s28 = scalar_lea.vmem [#allocation11], %s1236_s9  ;;  %s472_s10 = sand.u32 1, %s1166_s24  }
  0x80   : > { %453 = vst.msk [vmem:[#allocation3] sm:$0x3] %vm1246_vm1, %v452_v23  ;;  %s1359_s16 = sshll.u32 %s317_s28, 4  ;;  %s513_s13 = sshll.u32 %s509_s21, 4  ;;  %s512_s16 = int_to_ptr.vmem [resolvable:$true] %s1359_s16  ;;  %s514_s13 = int_to_ptr.hbm [resolvable:$true] %s513_s13 }
  0x81   : > { %s324_s14 = scalar_lea.vmem [#allocation13], %s1236_s9  ;;  %s1365_s29 = sshll.u32 %s523_s15, 4  ;;  %s528_s29 = int_to_ptr.hbm [resolvable:$true] %s1365_s29 }
  0x82   : > { %s1363_s17 = sshll.u32 %s324_s14, 4  ;;  %s473_s24 = scalar_lea.sflag [#allocation12], %s472_s10  ;;  %s526_s17 = int_to_ptr.vmem [resolvable:$true] %s1363_s17 }
  0x83   : > { %s993_s9 = sshra.s32 %s514_s13, 4  ;;  %s999_s26 = scalar_lea.hbm %s1428_s3, 4  ;;  %s994_s9 = int_to_ptr.hbm [resolvable:$true] %s993_s9 }
  0x84   : > { %s995_s30 = scalar_lea.hbm %s994_s9, 2  ;;  %p1000_p13 = scmp.lt.s32.totalorder %s994_s9, %s1428_s3 }
  0x85   : > { %p996_p7 = scmp.ne.s32.totalorder %s994_s9, %s995_s30  ;;  %p1001_p0 = scmp.lt.s32.totalorder %s999_s26, %s995_s30 }
  0x86   : > { %v461_v24 = vld [vmem:[#allocation2] sm:$0x3] }
  0x87   : > { %462 = vst.msk [vmem:[%s317_s28] sm:$0x3] %vm1246_vm1, %v461_v24  ;;  %v463_v25 = vld [vmem:[#allocation3] sm:$0x3]  ;;  %p997_p8 = pnand %p996_p7, %p1190_p9  ;;  %p1002_p1 = por %p1001_p0, %p1000_p13 }
  0x88   : > { %464 = vst.msk [vmem:[%s324_s14] sm:$0x3] %vm1246_vm1, %v463_v25 }
  0x89   : > { %p998_p10 = pneg %p997_p8 }
  0x8b   : > { %p1003_p2 = pnand %p1002_p1, %p998_p10 }
  0x8d   : > { %1006 = shalt.err (!%p1003_p2)
}
  0x8e   : > { %778 = dma.vmem_to_hbm [thread:$0]  (%p1190_p9), %s512_s16, 32, %s514_s13, %s473_s24  }
  0x8f   : > { %s1021_s12 = sshra.s32 %s528_s29, 4  ;;  %s1027_s10 = scalar_lea.hbm %s1429_s4, 4  ;;  %s1022_s12 = int_to_ptr.hbm [resolvable:$true] %s1021_s12 }
  0x90   : > { %s1023_s11 = scalar_lea.hbm %s1022_s12, 2  ;;  %p1028_p6 = scmp.lt.s32.totalorder %s1022_s12, %s1429_s4 }
  0x91   : > { %p1024_p3 = scmp.ne.s32.totalorder %s1022_s12, %s1023_s11  ;;  %p1029_p7 = scmp.lt.s32.totalorder %s1027_s10, %s1023_s11 }
  0x93   : > { %p1025_p4 = pnand %p1024_p3, %p1190_p9  ;;  %p1030_p8 = por %p1029_p7, %p1028_p6 }
  0x95   : > { %p1026_p5 = pneg %p1025_p4 }
  0x97   : > { %p1031_p10 = pnand %p1030_p8, %p1026_p5 }
  0x99   : > { %1034 = shalt.err (!%p1031_p10)
}
  0x9a   : > { %779 = dma.vmem_to_hbm [thread:$0]  (%p1190_p9), %s526_s17, 32, %s528_s29, %s473_s24  }
  0x9b PF: > { %s553_s16 = sand.u32 1, %s1081_s18   ;;  %p793_p13 = pnand %p749_p12, %p1199_p11 }
  0x9c   : > { %s554_s13 = scalar_lea.sflag [#allocation7], %s553_s16 }
  0x9d   : > { %p794_p0 = pneg %p793_p13 }
  0x9f   : > { %1068 = dma.done.wait (%p794_p0), %s554_s13, 32  }
  0xa0   : > { %1070 = vsyncadd (%p794_p0), %s554_s13, 4294967264  ;;  %s1447_s30 = sadd.s32 4294967294, %s1101_s23  }
  0xa1   : > { %s563_s6 = sand.u32 1, %s1447_s30  }
  0xa2   : > { %s564_s0 = scalar_lea.sflag [#allocation12], %s563_s6 }
  0xa3   : > { %1072 = dma.done.wait (%p794_p0), %s564_s0, 64  }
  0xa4   : > { %1074 = vsyncadd (%p794_p0), %s564_s0, 4294967232  ;;  %s584_s25 = scalar_lea.sflag [#allocation15], %s553_s16 }
  0xa5   : > { %1076 = dma.done.wait (%p794_p0), %s584_s25, 32  }
  0xa6   : > { %1078 = vsyncadd (%p794_p0), %s584_s25, 4294967264  ;;  %s31_s23 = sadd.s32 1, %s1101_s23   ;;  %s1448_s8 = sld [smem:[#allocation21_spill]] }
  0xa7   : > { %p28_p9 = scmp.ge.s32.totalorder %s31_s23, 4   ;;  %s1449_s18 = smov %s1085_s19 }
  0xa8   : > { %s1450_s19 = smov %s1089_s20  ;;  %s1451_s20 = smov %s1197_s7 }
  0xa9   : > { %s1452_s21 = smov %s1097_s22  ;;  %30 = sbr.rel (!%p28_p9) target bundleno = 14 (0xe), region = 143 }
  0xac   : > { %s1453_s22 = smov %s1448_s8 }
  0xae   :  { %590 = vsyncpa [#allocation6], 1 }
  0xaf   :  { %592 = vsyncpa [#allocation6 + $0x1], 1 }
  0xb0   :  { %593 = vsyncpa [#allocation9], 1 }
  0xb1   :  { %595 = vsyncpa [#allocation9 + $0x1], 1 }
  0xb2   :  { %596 = vsyncpa [#allocation7], 1 }
  0xb3   :  { %598 = vsyncpa [#allocation7 + $0x1], 1 }
  0xb4   :  { %599 = vsyncpa [#allocation12], 1 }
  0xb5   :  { %601 = vsyncpa [#allocation12 + $0x1], 1 }
  0xb6   :  { %602 = vsyncpa [#allocation15], 1 }
  0xb7   :  { %604 = vsyncpa [#allocation15 + $0x1], 1 }

</bundles_post_ra>
